<compile_context>
chip_gen: v7x
topology: tpu7x:2x2x1
jax: 0.10.0
libtpu: 0.0.40
codegen_flags: <defaults>
</compile_context>

<pallas_src>
import jax
import jax.numpy as jnp
from jax.experimental import pallas as pl
from jax.experimental.pallas import tpu as pltpu


def _round_up(x, m):
    return ((x + m - 1) // m) * m


def classblock_kernel(x_ref, w1_ref, b1_ref, w2_ref, b2_ref, o_ref):
    # ---- Linear(input_dim -> bottleneck); BN already folded into w1/b1.
    #      bf16 operands, f32 accumulation on the MXU.
    h = jnp.dot(x_ref[...], w1_ref[...],
                preferred_element_type=jnp.float32) + b1_ref[...]

    # ---- LeakyReLU(negative_slope=0.1): max(h, 0.1*h) (valid since slope < 1).
    h = jnp.maximum(h, 0.1 * h)

    # ---- Dropout(p=0.5): identity in eval mode.

    # ---- classifier Linear(bottleneck -> class_num_padded).
    out = jnp.dot(h.astype(w2_ref.dtype), w2_ref[...],
                  preferred_element_type=jnp.float32) + b2_ref[...]
    o_ref[...] = out.astype(o_ref.dtype)


def class_block_forward(x, params, *, block_m=256):
    """x: (N, input_dim) float32. params: dict of weights (see init_params)."""
    w1, b1 = params["w1"], params["b1"]
    gamma, beta = params["gamma"], params["beta"]
    mean, var = params["running_mean"], params["running_var"]
    w2, b2 = params["w2"], params["b2"]

    N, input_dim = x.shape
    nb = w1.shape[1]
    class_num = w2.shape[1]

    # ---- Fold eval-mode BatchNorm1d into the first Linear (exact affine fold).
    scale = gamma * jax.lax.rsqrt(var + 1e-5)                 # (1, nb)
    w1_f = w1 * scale                                         # (input_dim, nb)
    b1_f = ((b1 - mean) * scale + beta).astype(jnp.float32)   # (1, nb)

    # ---- Pad feature dims to lane-dense multiples of 128 (exact zero padding).
    k_pad = _round_up(input_dim, 128)
    nb_pad = _round_up(nb, 128)
    c_pad = _round_up(class_num, 128)

    w1_p = jnp.zeros((k_pad, nb_pad), jnp.float32).at[:input_dim, :nb].set(w1_f)
    b1_p = jnp.zeros((1, nb_pad), jnp.float32).at[:, :nb].set(b1_f)
    w2_p = jnp.zeros((nb_pad, c_pad), jnp.float32).at[:nb, :class_num].set(w2)
    b2_p = jnp.zeros((1, c_pad), jnp.float32).at[:, :class_num].set(b2)

    # ---- Tile the batch dim; pad rows so the 1-D grid divides evenly.
    #      tm multiple of 16 (bf16 sublane packing).
    tm = min(block_m, _round_up(N, 16))
    n_pad = _round_up(N, tm)
    x_p = x
    if n_pad != N or k_pad != input_dim:
        x_p = jnp.zeros((n_pad, k_pad), x.dtype).at[:N, :input_dim].set(x)

    # ---- bf16 matmul operands (f32 accumulation in-kernel); biases stay f32.
    x_bf = x_p.astype(jnp.bfloat16)
    w1_bf = w1_p.astype(jnp.bfloat16)
    w2_bf = w2_p.astype(jnp.bfloat16)

    grid = (n_pad // tm,)

    in_specs = [
        pl.BlockSpec((tm, k_pad), lambda i: (i, 0)),      # x tile (pipelined)
        pl.BlockSpec((k_pad, nb_pad), lambda i: (0, 0)),  # folded w1 (resident)
        pl.BlockSpec((1, nb_pad), lambda i: (0, 0)),      # folded b1 (resident)
        pl.BlockSpec((nb_pad, c_pad), lambda i: (0, 0)),  # w2 (resident)
        pl.BlockSpec((1, c_pad), lambda i: (0, 0)),       # b2 (resident)
    ]
    out_specs = pl.BlockSpec((tm, c_pad), lambda i: (i, 0))

    # ---- Size VMEM request to the actual footprint (double buffers + resident
    #      weights) with headroom, clamped to <= 48 MiB (v7x has 64 MiB/TC).
    bytes_x = 2 * tm * k_pad * 2                          # double-buffered bf16
    bytes_out = 2 * tm * c_pad * 4                        # double-buffered f32
    bytes_w = 2 * (k_pad * nb_pad * 2 + nb_pad * c_pad * 2
                   + nb_pad * 4 + c_pad * 4)
    vmem_bytes = int(min(48 << 20,
                         max(4 << 20, 2 * (bytes_x + bytes_out + bytes_w))))

    flops = 2 * n_pad * (k_pad * nb_pad + nb_pad * c_pad)
    bytes_accessed = (x_bf.size * 2 + w1_bf.size * 2 + w2_bf.size * 2
                      + b1_p.size * 4 + b2_p.size * 4 + n_pad * c_pad * 4)

    out = pl.pallas_call(
        classblock_kernel,
        out_shape=jax.ShapeDtypeStruct((n_pad, c_pad), jnp.float32),
        grid=grid,
        in_specs=in_specs,
        out_specs=out_specs,
        compiler_params=pltpu.CompilerParams(
            dimension_semantics=("parallel",),
            vmem_limit_bytes=vmem_bytes),
        cost_estimate=pl.CostEstimate(
            flops=flops, transcendentals=0, bytes_accessed=bytes_accessed),
    )(x_bf, w1_bf, b1_p, w2_bf, b2_p)

    return out[:N, :class_num]


def init_params(key, input_dim, class_num, num_bottleneck):
    """Deterministic init mirroring weights_init_kaiming / weights_init_classifier."""
    k1, k2, k3 = jax.random.split(key, 3)

    # add_block Linear: kaiming_normal_(a=0, mode='fan_out') -> std = sqrt(2 / fan_out)
    std1 = (2.0 / num_bottleneck) ** 0.5
    w1 = jax.random.normal(k1, (input_dim, num_bottleneck), jnp.float32) * std1
    b1 = jnp.zeros((1, num_bottleneck), jnp.float32)

    # BatchNorm1d: weight ~ N(1, 0.02), bias = 0, running stats (0, 1)
    gamma = 1.0 + 0.02 * jax.random.normal(k2, (1, num_bottleneck), jnp.float32)
    beta = jnp.zeros((1, num_bottleneck), jnp.float32)
    running_mean = jnp.zeros((1, num_bottleneck), jnp.float32)
    running_var = jnp.ones((1, num_bottleneck), jnp.float32)

    # classifier Linear: weight ~ N(0, 0.001), bias = 0
    w2 = 0.001 * jax.random.normal(k3, (num_bottleneck, class_num), jnp.float32)
    b2 = jnp.zeros((1, class_num), jnp.float32)

    return dict(w1=w1, b1=b1, gamma=gamma, beta=beta,
                running_mean=running_mean, running_var=running_var,
                w2=w2, b2=b2)


if __name__ == "__main__":
    batch = 8
    input_dim = 64
    num_bottleneck = 128
    class_num = 16

    key = jax.random.PRNGKey(0)
    kx, kp = jax.random.split(key)

    x = jax.random.normal(kx, (batch, input_dim), jnp.float32)
    params = init_params(kp, input_dim, class_num, num_bottleneck)

    out = class_block_forward(x, params)
    jax.block_until_ready(out)

    # sanity: pure-JAX f32 reference (unfolded BN, eval mode)
    h = x @ params["w1"] + params["b1"]
    h = params["gamma"] * (h - params["running_mean"]) / jnp.sqrt(
        params["running_var"] + 1e-5) + params["beta"]
    h = jnp.where(h >= 0.0, h, 0.1 * h)
    ref = h @ params["w2"] + params["b2"]

    assert out.shape == (batch, class_num)
    # bf16 operands with f32 accumulation -> compare at a loose tolerance.
    max_err = float(jnp.max(jnp.abs(out - ref)))
    assert jnp.allclose(out, ref, atol=2e-3, rtol=5e-2), max_err

    print("KERNEL_OK")
</pallas_src>

<mosaic_0001>
module attributes {stable_mosaic.version = 11 : i64} {
  func.func @classblock_kernel(%arg0: i32, %arg1: memref<16x128xbf16, #tpu.memory_space<vmem>>, %arg2: memref<128x128xbf16, #tpu.memory_space<vmem>>, %arg3: memref<1x128xf32, #tpu.memory_space<vmem>>, %arg4: memref<128x128xbf16, #tpu.memory_space<vmem>>, %arg5: memref<1x128xf32, #tpu.memory_space<vmem>>, %arg6: memref<16x128xf32, #tpu.memory_space<vmem>>) attributes {dimension_semantics = [#tpu.dimension_semantics<parallel>], iteration_bounds = array<i64: 1>, scalar_prefetch = 0 : i64, scratch_operands = 0 : i64, tpu.core_type = #tpu.core_type<tc>, window_params = [{transform_indices = @transform_0, window_bounds = array<i64: 16, 128>}, {pipeline_mode = #tpu.pipeline_mode<synchronous>, transform_indices = @transform_1, window_bounds = array<i64: 128, 128>}, {pipeline_mode = #tpu.pipeline_mode<synchronous>, transform_indices = @transform_2, window_bounds = array<i64: 1, 128>}, {pipeline_mode = #tpu.pipeline_mode<synchronous>, transform_indices = @transform_3, window_bounds = array<i64: 128, 128>}, {pipeline_mode = #tpu.pipeline_mode<synchronous>, transform_indices = @transform_4, window_bounds = array<i64: 1, 128>}, {transform_indices = @transform_5, window_bounds = array<i64: 16, 128>}]} {
    %c0 = arith.constant 0 : index
    %c0_0 = arith.constant 0 : index
    %0 = vector.load %arg1[%c0, %c0_0] : memref<16x128xbf16, #tpu.memory_space<vmem>>, vector<16x128xbf16>
    %c0_1 = arith.constant 0 : index
    %c0_2 = arith.constant 0 : index
    %1 = vector.load %arg2[%c0_1, %c0_2] : memref<128x128xbf16, #tpu.memory_space<vmem>>, vector<128x128xbf16>
    %cst = arith.constant dense<0.000000e+00> : vector<16x128xf32>
    %2 = tpu.matmul %0, %1, %cst {dimension_numbers = #tpu.dot_dimension_numbers<[1], [0], [0], [1], [0, 0, 1, 1], [], []>} : vector<16x128xbf16>, vector<128x128xbf16>, vector<16x128xf32> -> vector<16x128xf32>
    %c0_3 = arith.constant 0 : index
    %c0_4 = arith.constant 0 : index
    %3 = vector.load %arg3[%c0_3, %c0_4] : memref<1x128xf32, #tpu.memory_space<vmem>>, vector<1x128xf32>
    %4 = vector.broadcast %3 : vector<1x128xf32> to vector<16x128xf32>
    %5 = arith.addf %2, %4 : vector<16x128xf32>
    %cst_5 = arith.constant 1.000000e-01 : f32
    %6 = vector.broadcast %cst_5 : f32 to vector<16x128xf32>
    %7 = arith.mulf %6, %5 : vector<16x128xf32>
    %8 = arith.maximumf %5, %7 : vector<16x128xf32>
    %9 = arith.truncf %8 : vector<16x128xf32> to vector<16x128xbf16>
    %c0_6 = arith.constant 0 : index
    %c0_7 = arith.constant 0 : index
    %10 = vector.load %arg4[%c0_6, %c0_7] : memref<128x128xbf16, #tpu.memory_space<vmem>>, vector<128x128xbf16>
    %cst_8 = arith.constant dense<0.000000e+00> : vector<16x128xf32>
    %11 = tpu.matmul %9, %10, %cst_8 {dimension_numbers = #tpu.dot_dimension_numbers<[1], [0], [0], [1], [0, 0, 1, 1], [], []>} : vector<16x128xbf16>, vector<128x128xbf16>, vector<16x128xf32> -> vector<16x128xf32>
    %c0_9 = arith.constant 0 : index
    %c0_10 = arith.constant 0 : index
    %12 = vector.load %arg5[%c0_9, %c0_10] : memref<1x128xf32, #tpu.memory_space<vmem>>, vector<1x128xf32>
    %13 = vector.broadcast %12 : vector<1x128xf32> to vector<16x128xf32>
    %14 = arith.addf %11, %13 : vector<16x128xf32>
    %c0_11 = arith.constant 0 : index
    %c0_12 = arith.constant 0 : index
    %15 = vector.load %arg6[%c0_11, %c0_12] : memref<16x128xf32, #tpu.memory_space<vmem>>, vector<16x128xf32>
    tpu.vector_store %arg6[%c0_11, %c0_12], %14 {strides = array<i32>} : memref<16x128xf32, #tpu.memory_space<vmem>>, vector<16x128xf32>,
    return
  }
  func.func @transform_0(%arg0: i32) -> (i32, i32) {
    %c0_i32 = arith.constant 0 : i32
    %c0_i32_0 = arith.constant 0 : i32
    return %arg0, %c0_i32 : i32, i32
  }
  func.func @transform_1(%arg0: i32) -> (i32, i32) {
    %c0_i32 = arith.constant 0 : i32
    %c0_i32_0 = arith.constant 0 : i32
    %c0_i32_1 = arith.constant 0 : i32
    return %c0_i32, %c0_i32_0 : i32, i32
  }
  func.func @transform_2(%arg0: i32) -> (i32, i32) {
    %c0_i32 = arith.constant 0 : i32
    %c0_i32_0 = arith.constant 0 : i32
    %c0_i32_1 = arith.constant 0 : i32
    return %c0_i32, %c0_i32_0 : i32, i32
  }
  func.func @transform_3(%arg0: i32) -> (i32, i32) {
    %c0_i32 = arith.constant 0 : i32
    %c0_i32_0 = arith.constant 0 : i32
    %c0_i32_1 = arith.constant 0 : i32
    return %c0_i32, %c0_i32_0 : i32, i32
  }
  func.func @transform_4(%arg0: i32) -> (i32, i32) {
    %c0_i32 = arith.constant 0 : i32
    %c0_i32_0 = arith.constant 0 : i32
    %c0_i32_1 = arith.constant 0 : i32
    return %c0_i32, %c0_i32_0 : i32, i32
  }
  func.func @transform_5(%arg0: i32) -> (i32, i32) {
    %c0_i32 = arith.constant 0 : i32
    %c0_i32_0 = arith.constant 0 : i32
    return %arg0, %c0_i32 : i32, i32
  }
}

</mosaic_0001>

<bundles_post_ra>
// kernel: tpu_custom_call.1
= control target key start
LH: loop header
LB: loop body
LE: loop exit
PB: predicated region body
PF: predicated region fallthrough
CT: control target
= control target key end

     0   :  { %10 = vsyncpa [#allocation3], 0  ;;  %s628_s0 = inlined_call_operand.hbm [shape: bf16[16,128], index: 0, kind: input, shape index: {}]   ;;  %s629_s1 = inlined_call_operand.hbm [shape: bf16[128,128], index: 1, kind: input, shape index: {}]   ;;  %s630_s2 = inlined_call_operand.vmem [shape: f32[1,128], index: 2, kind: input, shape index: {}]   ;;  %s631_s3 = inlined_call_operand.hbm [shape: bf16[128,128], index: 3, kind: input, shape index: {}]   ;;  %s632_s4 = inlined_call_operand.vmem [shape: f32[1,128], index: 4, kind: input, shape index: {}]   ;;  %s633_s5 = inlined_call_operand.hbm [shape: f32[16,128], index: 5, kind: output, shape index: {}]  }
   0x1   :  { %11 = vsyncpa [#allocation6], 0 }
   0x2   :  { %12 = vsyncpa [#allocation4], 0  ;;  %s518_s18 = smov [#allocation5]   ;;  %s519_s20 = smov [#allocation2]  }
   0x3   :  { %s30_s19 = sshll.u32 %s518_s18, 4  ;;  %s18_s21 = sshll.u32 %s519_s20, 4  ;;  %s31_s19 = int_to_ptr.vmem [resolvable:$true] %s30_s19  ;;  %s558_s21 = int_to_ptr.vmem [resolvable:$true] %s18_s21 }
   0x4   :  { %s424_s24 = scalar_lea.hbm %s629_s1, 1024 }
   0x5   :  { %p425_p0 = scmp.ne.s32.totalorder %s629_s1, %s424_s24  ;;  %p428_p1 = scmp.lt.u32.totalorder %s424_s24, %s629_s1 }
   0x7   :  { %p430_p2 = pnand %p428_p1, %p425_p0 }
   0x9   :  { %433 = shalt.err (!%p430_p2)
}
   0xa   :  { %s434_s29 = scalar_lea.vmem %s31_s19, 1024  ;;  %p439_p4 = scmp.lt.s32.totalorder %s31_s19, %s31_s19 }
   0xb   :  { %p435_p3 = scmp.ne.s32.totalorder %s31_s19, %s434_s29  ;;  %p440_p5 = scmp.lt.s32.totalorder %s434_s29, %s434_s29 }
   0xd   :  { %p441_p6 = por %p440_p5, %p439_p4 }
   0xf   :  { %p442_p7 = pnand %p441_p6, %p435_p3 }
  0x11   :  { %445 = shalt.err (!%p442_p7)
}
  0x12   :  { %s520_s30 = smov 64   ;;  %s521_s6 = smov 4  }
  0x13   :  { %36 = dma.hbm_to_vmem [thread:$0]  %s629_s1, 1024, %s31_s19, [#allocation6], %s520_s30, %s520_s30, %s521_s6  }
  0x14   :  { %s446_s11 = scalar_lea.hbm %s628_s0, 128 }
  0x15   :  { %p447_p8 = scmp.ne.s32.totalorder %s628_s0, %s446_s11  ;;  %p450_p9 = scmp.lt.u32.totalorder %s446_s11, %s628_s0 }
  0x17   :  { %p452_p10 = pnand %p450_p9, %p447_p8 }
  0x19   :  { %455 = shalt.err (!%p452_p10)
}
  0x1a   :  { %s456_s16 = scalar_lea.vmem %s558_s21, 128  ;;  %p461_p12 = scmp.lt.s32.totalorder %s558_s21, %s558_s21 }
  0x1b   :  { %p457_p11 = scmp.ne.s32.totalorder %s558_s21, %s456_s16  ;;  %p462_p13 = scmp.lt.s32.totalorder %s456_s16, %s456_s16 }
  0x1d   :  { %p463_p0 = por %p462_p13, %p461_p12 }
  0x1f   :  { %p464_p1 = pnand %p463_p0, %p457_p11 }
  0x21   :  { %467 = shalt.err (!%p464_p1)
}
  0x22   :  { %24 = dma.hbm_to_vmem [thread:$0]  %s628_s0, 128, %s558_s21, [#allocation3], %s520_s30, %s520_s30, %s521_s6  }
  0x23   :  { %s522_s18 = smov [#allocation7]   ;;  %s468_s23 = scalar_lea.hbm %s631_s3, 1024 }
  0x24   :  { %s44_s19 = sshll.u32 %s522_s18, 4  ;;  %p469_p2 = scmp.ne.s32.totalorder %s631_s3, %s468_s23  ;;  %s45_s19 = int_to_ptr.vmem [resolvable:$true] %s44_s19 }
  0x25   :  { %p472_p3 = scmp.lt.u32.totalorder %s468_s23, %s631_s3 }
  0x27   :  { %p474_p4 = pnand %p472_p3, %p469_p2 }
  0x29   :  { %477 = shalt.err (!%p474_p4)
}
  0x2a   :  { %s478_s28 = scalar_lea.vmem %s45_s19, 1024  ;;  %p483_p6 = scmp.lt.s32.totalorder %s45_s19, %s45_s19 }
  0x2b   :  { %p479_p5 = scmp.ne.s32.totalorder %s45_s19, %s478_s28  ;;  %p484_p7 = scmp.lt.s32.totalorder %s478_s28, %s478_s28 }
  0x2d   :  { %p485_p8 = por %p484_p7, %p483_p6 }
  0x2f   :  { %p486_p9 = pnand %p485_p8, %p479_p5 }
  0x31   :  { %489 = shalt.err (!%p486_p9)
}
  0x32   :  { %50 = dma.hbm_to_vmem [thread:$0]  %s631_s3, 1024, %s45_s19, [#allocation6], %s520_s30, %s520_s30, %s521_s6  }
  0x33   :  { %512 = dma.done.wait [#allocation3], 128  }
  0x34   :  { %513 = vsyncadd [#allocation3], 4294967168 }
  0x35   :  { %514 = dma.done.wait [#allocation6], 2048  }
  0x36   :  { %515 = vsyncadd [#allocation6], 4294965248  ;;  %v523_v0 = vmov 0.0   ;;  %vm524_vm0 = vmmov 0   ;;  %v407_v1 = vld [vmem:[#allocation5] sm:$0xff]   ;;  %v408_v2 = vld [vmem:[#allocation5 + $0x8] sm:$0xff]  }
  0x37   :  { %357 = vmatprep.subr.bf16.mxu0 %v523_v0  ;;  %373 = vmatprep.mubr.msk.bf16.mxu0 %vm524_vm0, %v523_v0  ;;  %v409_v3 = vld [vmem:[#allocation5 + $0x10] sm:$0xff]   ;;  %v416_v4 = vld [vmem:[#allocation7] sm:$0xff]   ;;  %v410_v5 = vld [vmem:[#allocation5 + $0x18] sm:$0xff]   ;;  %s525_s7 = smov [#allocation8]  }
  0x38   :  { %377 = vmatprep.subr.bf16.mxu1 %v523_v0  ;;  %393 = vmatprep.mubr.msk.bf16.mxu1 %vm524_vm0, %v523_v0  ;;  %v417_v6 = vld [vmem:[#allocation7 + $0x8] sm:$0xff]   ;;  %v411_v7 = vld [vmem:[#allocation5 + $0x20] sm:$0xff]   ;;  %v418_v8 = vld [vmem:[#allocation7 + $0x10] sm:$0xff]   ;;  %s307_s8 = sshll.u32 %s525_s7, 4  ;;  %s308_s8 = int_to_ptr.vmem [resolvable:$true] %s307_s8 }
  0x39   :  { %358 = vmatpush3.bf16.msra.mxu0 %v407_v1  ;;  %378 = vmatpush3.bf16.msra.mxu1 %v416_v4  ;;  %v412_v9 = vld [vmem:[#allocation5 + $0x28] sm:$0xff]   ;;  %v419_v10 = vld [vmem:[#allocation7 + $0x18] sm:$0xff]   ;;  %v413_v11 = vld [vmem:[#allocation5 + $0x30] sm:$0xff]   ;;  %p495_p11 = scmp.lt.s32.totalorder %s308_s8, %s308_s8 }
  0x3a   :  { %359 = vmatprep.subr.bf16.mxu0 %v523_v0  ;;  %379 = vmatprep.subr.bf16.mxu1 %v523_v0  ;;  %v420_v12 = vld [vmem:[#allocation7 + $0x20] sm:$0xff]   ;;  %v414_v13 = vld [vmem:[#allocation5 + $0x38] sm:$0xff]   ;;  %v421_v15 = vld [vmem:[#allocation7 + $0x28] sm:$0xff]  }
  0x3b   :  { %v415_v14 = vld [vmem:[#allocation2] sm:$0xff]   ;;  %v422_v16 = vld [vmem:[#allocation7 + $0x30] sm:$0xff]  }
  0x3c   :  { %v423_v17 = vld [vmem:[#allocation7 + $0x38] sm:$0xff]  }
  0x3d   :  { %360 = vmatpush3.bf16.msra.mxu0 %v408_v2  ;;  %380 = vmatpush3.bf16.msra.mxu1 %v417_v6  ;;  %v320_v18 = vld [vmem:[%s630_s2] ss:$0 sm:$0xff]  ;;  %s490_s2 = scalar_lea.vmem %s308_s8, 256 }
  0x3e   :  { %361 = vmatprep.subr.bf16.mxu0 %v523_v0  ;;  %381 = vmatprep.subr.bf16.mxu1 %v523_v0  ;;  %v330_v30 = vld [vmem:[%s632_s4] ss:$0 sm:$0xff]  ;;  %p491_p10 = scmp.ne.s32.totalorder %s308_s8, %s490_s2  ;;  %p496_p12 = scmp.lt.s32.totalorder %s490_s2, %s490_s2 }
  0x40   :  { %p497_p13 = por %p496_p12, %p495_p11 }
  0x41   :  { %362 = vmatpush3.bf16.msra.mxu0 %v409_v3  ;;  %382 = vmatpush3.bf16.msra.mxu1 %v418_v8 }
  0x42   :  { %363 = vmatprep.subr.bf16.mxu0 %v523_v0  ;;  %383 = vmatprep.subr.bf16.mxu1 %v523_v0  ;;  %p498_p0 = pnand %p497_p13, %p491_p10 }
  0x45   :  { %364 = vmatpush3.bf16.msra.mxu0 %v410_v5  ;;  %384 = vmatpush3.bf16.msra.mxu1 %v419_v10 }
  0x46   :  { %365 = vmatprep.subr.bf16.mxu0 %v523_v0  ;;  %385 = vmatprep.subr.bf16.mxu1 %v523_v0 }
  0x49   :  { %366 = vmatpush3.bf16.msra.mxu0 %v411_v7  ;;  %386 = vmatpush3.bf16.msra.mxu1 %v420_v12 }
  0x4a   :  { %367 = vmatprep.subr.bf16.mxu0 %v523_v0  ;;  %387 = vmatprep.subr.bf16.mxu1 %v523_v0 }
  0x4d   :  { %368 = vmatpush3.bf16.msra.mxu0 %v412_v9  ;;  %388 = vmatpush3.bf16.msra.mxu1 %v421_v15 }
  0x4e   :  { %369 = vmatprep.subr.bf16.mxu0 %v523_v0  ;;  %389 = vmatprep.subr.bf16.mxu1 %v523_v0 }
  0x51   :  { %370 = vmatpush3.bf16.msra.mxu0 %v413_v11  ;;  %390 = vmatpush3.bf16.msra.mxu1 %v422_v16 }
  0x52   :  { %371 = vmatprep.subr.bf16.mxu0 %v523_v0  ;;  %391 = vmatprep.subr.bf16.mxu1 %v523_v0 }
  0x55   :  { %372 = vmatpush3.bf16.msra.mxu0 %v414_v13  ;;  %392 = vmatpush3.bf16.msra.mxu1 %v423_v17 }
  0x58   :  { %374 = vmatmul.mubr.bf16.vlgmr.msra.gmra.mrb[0].mxu0 %v415_v14 }
 0x12b   :  { %v176_v19 = vpop.f32.mrb[0].mxu0 }
 0x12c   :  { %v177_v20 = vadd.f32 %v320_v18, %v176_v19  ;;  %v375_v21 = vpop.f32.mrb[1].mxu0 }
 0x12d   :  { %v179_v22 = vpop.f32.mrb[2].mxu0 }
 0x12e   :  { %v183_v23 = vmul.f32 0.1, %v177_v20  ;;  %v180_v24 = vadd.f32 %v320_v18, %v179_v22  ;;  %v376_v25 = vpop.f32.mrb[3].mxu0 }
 0x130   :  { %v184_v26 = vmul.f32 0.1, %v180_v24  ;;  %v185_v27 = vmax.f32 %v177_v20, %v183_v23 }
 0x132   :  { %v186_v28 = vmax.f32 %v180_v24, %v184_v26 }
 0x134   :  { %v187_v29 = vpack.c.bf16 %v186_v28, %v185_v27 }
 0x136   :  { %394 = vmatmul.mubr.bf16.vlgmr.msra.gmra.mrb[0].mxu1 %v187_v29 }
 0x209   :  { %v293_v31 = vpop.f32.mrb[0].mxu1 }
 0x20a   :  { %v294_v32 = vadd.f32 %v330_v30, %v293_v31  ;;  %v395_v33 = vpop.f32.mrb[1].mxu1 }
 0x20b   :  { %v296_v34 = vpop.f32.mrb[2].mxu1 }
 0x20c   :  { %300 = vst [vmem:[#allocation8] sm:$0xff] %v294_v32  ;;  %v297_v35 = vadd.f32 %v330_v30, %v296_v34  ;;  %v396_v36 = vpop.f32.mrb[3].mxu1 }
 0x20e   :  { %301 = vst [vmem:[#allocation8 + $0x8] sm:$0xff] %v297_v35 }
 0x20f   :  { %501 = shalt.err (!%p498_p0)
}
 0x210   :  { %s502_s10 = scalar_lea.hbm %s633_s5, 256 }
 0x211   :  { %p503_p1 = scmp.ne.s32.totalorder %s633_s5, %s502_s10  ;;  %p506_p2 = scmp.lt.u32.totalorder %s502_s10, %s633_s5 }
 0x213   :  { %p508_p3 = pnand %p506_p2, %p503_p1 }
 0x215   :  { %511 = shalt.err (!%p508_p3)
}
 0x216   :  { %s526_s15 = smov 128   ;;  %s527_s16 = smov 8  }
 0x217   :  { %313 = dma.vmem_to_hbm [thread:$0]  %s308_s8, 256, %s633_s5, [#allocation4], %s526_s15, %s526_s15, %s527_s16  }
 0x218   :  { %516 = dma.done.wait [#allocation4], 256  }
 0x219   :  { %517 = vsyncadd [#allocation4], 4294967040 }
 0x21a   :  { %317 = vsyncpa [#allocation3], 1 }
 0x21b   :  { %318 = vsyncpa [#allocation6], 1 }
 0x21c   :  { %319 = vsyncpa [#allocation4], 1 }

</bundles_post_ra>
